<compile_context>
chip_gen: v6e
topology: v6e:2x2x1
jax: 0.10.0
libtpu: 0.0.40
codegen_flags: <defaults>
</compile_context>

<pallas_src>
import functools

import jax
import jax.numpy as jnp
from jax.experimental import pallas as pl
from jax.experimental.pallas import tpu as pltpu

_LANE = 128


def _round_up(v, m):
    return -(-v // m) * m


# ----------------------------------------------------------------------------
# Fused kernel.  grid = (num_layers, num_row_tiles), both axes sequential.
#   refs:    a_ref   - A_hat: streamed (tm, n_pad) slab OR pl.ANY HBM ref
#            xw0_ref - pl.ANY HBM ref holding X @ W_0 (padded, compute dtype)
#            w_ref   - W_{l+1} (clamped) block (1, f_pad, f_pad), compute dtype
#            b_ref   - bias block (1, 1, f_pad), f32
#            o_ref   - output block (tm, f_pad), f32 (written at last layer only)
#   scratch: xw_cur, xw_nxt - (n_pad, f_pad) compute dtype
#            dma_sem        - DMA semaphores for the one-time prologue copies
#            [a_vmem]       - (n_pad, n_pad) resident A_hat (fast path only)
# ----------------------------------------------------------------------------
def _fused_gcn_kernel(a_ref, xw0_ref, w_ref, b_ref, o_ref,
                      xw_cur, xw_nxt, dma_sem, *maybe_a_vmem,
                      a_resident, out_c, tm):
    a_vmem = maybe_a_vmem[0] if a_resident else None

    l = pl.program_id(0)
    i = pl.program_id(1)
    n_layers = pl.num_programs(0)
    n_tiles = pl.num_programs(1)

    # One-time prologue: DMA X @ W_0 (and, on the fast path, all of A_hat)
    # from HBM into VMEM scratch.  These inputs are pl.ANY, so they are not
    # auto-pipelined / double-buffered by the pipeline.
    @pl.when(jnp.logical_and(l == 0, i == 0))
    def _():
        cp_xw = pltpu.make_async_copy(xw0_ref, xw_cur, dma_sem.at[0])
        cp_xw.start()
        if a_resident:
            cp_a = pltpu.make_async_copy(a_ref, a_vmem, dma_sem.at[1])
            cp_a.start()
            cp_a.wait()
        cp_xw.wait()

    r0 = pl.multiple_of(i * tm, tm)
    if a_resident:
        a_slab = a_vmem[pl.ds(r0, tm), :]
    else:
        a_slab = a_ref[...]

    # Aggregation for this row slab: [tm, n_pad] @ [n_pad, f_pad], f32 accum.
    # NOTE: padded COLUMNS of A_hat are zero, which is what masks out the
    # garbage accumulating in the padded node rows of xw_* across layers.
    out = jnp.dot(a_slab, xw_cur[...], preferred_element_type=jnp.float32)
    out = out + b_ref[0]

    is_last = l == n_layers - 1

    @pl.when(jnp.logical_not(is_last))
    def _():
        # ReLU, then the NEXT layer's feature transform folded into this row
        # tile's epilogue (no serial whole-graph X@W bubble per layer).
        h = jnp.maximum(out, 0.0).astype(xw_nxt.dtype)
        xw_t = jnp.dot(h, w_ref[0], preferred_element_type=jnp.float32)
        xw_nxt[pl.ds(r0, tm), :] = xw_t.astype(xw_nxt.dtype)

        # Hand the completed transform to the next layer.  Correctness relies
        # on strictly sequential grid execution over the row-tile axis
        # (scratch carry) -- do NOT mark that axis 'parallel'.
        @pl.when(i == n_tiles - 1)
        def _():
            xw_cur[...] = xw_nxt[...]

    @pl.when(is_last)
    def _():
        # Masked, max-stabilized log_softmax over the first `out_c` lanes
        # (remaining lanes are zero padding).
        cols = jax.lax.broadcasted_iota(jnp.int32, out.shape, 1)
        valid = cols < out_c
        z = jnp.where(valid, out, -jnp.inf)
        m = jnp.max(z, axis=1, keepdims=True)
        s = z - m
        lse = jnp.log(jnp.sum(jnp.exp(s), axis=1, keepdims=True))
        o_ref[...] = jnp.where(valid, s - lse, 0.0)


# ----------------------------------------------------------------------------
# Wrapper: per-layer padding, layer-0 transform in XLA, VMEM budgeting,
# pallas_call construction.
# ----------------------------------------------------------------------------
def gnn_forward(x, edge_index, params, *, a_dtype=jnp.bfloat16, tm=None,
                a_resident=None, vmem_budget_bytes=None):
    """GNN(layer_name='GCN').forward in eval mode (dropout == identity)."""
    n, _ = x.shape
    num_layers = len(params)
    out_c = params[-1][0].shape[1]
    cd = jnp.dtype(a_dtype)            # compute/storage dtype for A, W, activations

    # Per-layer padding: only hidden/output widths live in the kernel; the
    # (possibly much wider) input width is consumed by the layer-0 X @ W below.
    feat_dims = [w.shape[1] for (w, _) in params] + \
                [w.shape[0] for (w, _) in params[1:]]
    f_pad = _round_up(max(feat_dims + [_LANE]), _LANE)
    n_pad = _round_up(n, _LANE)

    # ---- VMEM budget / tile-size / A-residency selection --------------------
    a_bytes = cd.itemsize
    if vmem_budget_bytes is None:
        try:
            vmem_cap = pltpu.get_tpu_info().vmem_capacity_bytes
        except Exception:
            vmem_cap = 64 << 20        # conservative: v7x per-TC VMEM
        vmem_budget_bytes = max(vmem_cap - (16 << 20), 32 << 20)

    fixed = 2 * n_pad * f_pad * a_bytes        # xw_cur + xw_nxt scratch
    fixed += 2 * f_pad * f_pad * a_bytes       # W block (double-buffered)
    fixed += 2 * 1 * f_pad * 4                 # bias block (double-buffered)

    def _need(tm_, resident_):
        out_buf = 2 * tm_ * f_pad * 4
        a_need = n_pad * n_pad * a_bytes if resident_ else 2 * tm_ * n_pad * a_bytes
        return fixed + out_buf + a_need

    if tm is not None:
        assert n_pad % tm == 0, "tm must divide the 128-padded node count"
        tm_cands = [tm]
    else:
        tm_cands = [t for t in (512, 256, 128) if t <= n_pad and n_pad % t == 0] or [_LANE]
    res_cands = (True, False) if a_resident is None else (bool(a_resident),)

    chosen = None
    for res in res_cands:              # prefer resident A (cuts HBM reads L x)
        for t in tm_cands:             # then the largest tile that fits
            if _need(t, res) <= vmem_budget_bytes:
                chosen = (t, res)
                break
        if chosen is not None:
            break
    if chosen is None:
        chosen = (tm_cands[-1], res_cands[-1])   # best effort
    tm_, res_ = chosen
    n_tiles = n_pad // tm_
    vmem_limit = int(min(max(_need(tm_, res_) + (8 << 20), 32 << 20), 112 << 20))

    # ---- Operand preparation -------------------------------------------------
    # Normalized adjacency (dense), zero-padded; padded columns MUST stay zero.
    a_hat = build_norm_adj(edge_index, n)
    a_pad = jnp.zeros((n_pad, n_pad), jnp.float32).at[:n, :n].set(a_hat).astype(cd)

    # Layer-0 feature transform outside the kernel (plain XLA matmul, f32).
    w0, _ = params[0]
    xw0 = jnp.dot(x, w0)
    xw0_pad = jnp.zeros((n_pad, f_pad), cd).at[:n, :w0.shape[1]].set(xw0.astype(cd))

    # Weights of layers 1..L-1: layer l's kernel step needs W_{l+1}.
    l_stack = max(num_layers - 1, 1)
    w_stack = jnp.zeros((l_stack, f_pad, f_pad), jnp.float32)
    for j in range(1, num_layers):
        wj, _ = params[j]
        w_stack = w_stack.at[j - 1, :wj.shape[0], :wj.shape[1]].set(wj)
    w_stack = w_stack.astype(cd)

    b_stack = jnp.zeros((num_layers, 1, f_pad), jnp.float32)
    for j, (_, bj) in enumerate(params):
        b_stack = b_stack.at[j, 0, :bj.shape[0]].set(bj)

    # ---- pallas_call ---------------------------------------------------------
    kern = functools.partial(_fused_gcn_kernel, a_resident=res_,
                             out_c=out_c, tm=tm_)

    if res_:
        a_spec = pl.BlockSpec(memory_space=pl.ANY)            # one manual DMA
    else:
        a_spec = pl.BlockSpec((tm_, n_pad), lambda l, i: (i, 0))  # streamed slabs

    scratch = [
        pltpu.VMEM((n_pad, f_pad), cd),     # xw_cur: current layer's X @ W
        pltpu.VMEM((n_pad, f_pad), cd),     # xw_nxt: next layer's X @ W
        pltpu.SemaphoreType.DMA((2,)),      # prologue DMA semaphores
    ]
    if res_:
        scratch.append(pltpu.VMEM((n_pad, n_pad), cd))        # resident A_hat

    out_pad = pl.pallas_call(
        kern,
        out_shape=jax.ShapeDtypeStruct((n_pad, f_pad), jnp.float32),
        grid=(num_layers, n_tiles),
        in_specs=[
            a_spec,
            pl.BlockSpec(memory_space=pl.ANY),                        # X @ W_0
            pl.BlockSpec((1, f_pad, f_pad),
                         lambda l, i: (jnp.minimum(l, l_stack - 1), 0, 0)),
            pl.BlockSpec((1, 1, f_pad), lambda l, i: (l, 0, 0)),
        ],
        # Hidden layers never write the output; collapse their block index so
        # no garbage tile is ever written back to HBM.
        out_specs=pl.BlockSpec(
            (tm_, f_pad),
            lambda l, i: (jnp.where(l == num_layers - 1, i, 0), 0)),
        scratch_shapes=scratch,
        compiler_params=pltpu.CompilerParams(
            # Both axes 'arbitrary': layer l+1 depends on every row tile of
            # layer l through the VMEM-resident xw scratch carry.
            dimension_semantics=("arbitrary", "arbitrary"),
            vmem_limit_bytes=vmem_limit,
        ),
    )(a_pad, xw0_pad, w_stack, b_stack)

    return out_pad[:n, :out_c]


# ----------------------------------------------------------------------------
# Glue: parameters and normalized adjacency
# ----------------------------------------------------------------------------
def init_params(key, in_channels, hid_channels, out_channels, num_layers):
    """Deterministic Glorot-uniform init for the GCN layer weights."""
    dims = [in_channels] + [hid_channels] * (num_layers - 1) + [out_channels]
    params = []
    for i in range(num_layers):
        key, kw = jax.random.split(key)
        fan_in, fan_out = dims[i], dims[i + 1]
        limit = jnp.sqrt(6.0 / (fan_in + fan_out))
        w = jax.random.uniform(kw, (fan_in, fan_out), jnp.float32, -limit, limit)
        b = jnp.zeros((fan_out,), jnp.float32)
        params.append((w, b))
    return params


def build_norm_adj(edge_index, num_nodes):
    """A_hat = D^{-1/2} (A + I) D^{-1/2} as a dense [N, N] matrix.

    NOTE: only A[dst, src] is set (directed); PyG GCNConv assumes edge_index
    already contains both directions for undirected graphs.
    """
    src, dst = edge_index[0], edge_index[1]
    a = jnp.zeros((num_nodes, num_nodes), jnp.float32)
    a = a.at[dst, src].set(1.0)                                  # src -> dst
    a = jnp.maximum(a, jnp.eye(num_nodes, dtype=jnp.float32))    # self loops
    deg = jnp.sum(a, axis=1)
    d_inv_sqrt = jax.lax.rsqrt(deg)
    return a * d_inv_sqrt[:, None] * d_inv_sqrt[None, :]


def gnn_forward_ref(x, edge_index, params, a_dtype=jnp.float32):
    """Pure-JAX reference, precision-matched to the kernel's a_dtype path."""
    cd = jnp.dtype(a_dtype)
    n = x.shape[0]
    hp = jax.lax.Precision.HIGHEST
    a_hat = build_norm_adj(edge_index, n).astype(cd)
    num_layers = len(params)
    xw = jnp.dot(x, params[0][0]).astype(cd)       # layer-0 transform (XLA f32)
    out = None
    for l, (_, b) in enumerate(params):
        out = jnp.dot(a_hat, xw, preferred_element_type=jnp.float32,
                      precision=hp) + b
        if l < num_layers - 1:
            h = jnp.maximum(out, 0.0).astype(cd)
            xw = jnp.dot(h, params[l + 1][0].astype(cd),
                         preferred_element_type=jnp.float32,
                         precision=hp).astype(cd)
    return jax.nn.log_softmax(out, axis=1)


# ----------------------------------------------------------------------------
if __name__ == "__main__":
    key = jax.random.PRNGKey(0)

    def make_case(k, n, in_c, hid_c, out_c, layers, e):
        kx, ks, kd, kp = jax.random.split(k, 4)
        xv = jax.random.normal(kx, (n, in_c), jnp.float32)
        src = jax.random.randint(ks, (e,), 0, n)
        dst = jax.random.randint(kd, (e,), 0, n)
        ei = jnp.stack([src, dst], axis=0)
        ps = init_params(kp, in_c, hid_c, out_c, layers)
        return xv, ei, ps

    k1, k2 = jax.random.split(key)

    # Case 1: small graph, 2 layers (single row tile, VMEM-resident A).
    x, ei, params = make_case(k1, 64, 16, 32, 8, 2, 128)

    out_f32 = jax.block_until_ready(gnn_forward(x, ei, params, a_dtype=jnp.float32))
    ref_f32 = gnn_forward_ref(x, ei, params, a_dtype=jnp.float32)
    assert out_f32.shape == (64, 8)
    assert jnp.allclose(out_f32, ref_f32, atol=5e-3, rtol=5e-3), "f32 mismatch (case 1)"

    out_bf16 = jax.block_until_ready(gnn_forward(x, ei, params, a_dtype=jnp.bfloat16))
    ref_bf16 = gnn_forward_ref(x, ei, params, a_dtype=jnp.bfloat16)
    assert jnp.allclose(out_bf16, ref_bf16, atol=5e-2, rtol=5e-2), "bf16 mismatch (case 1)"

    # Case 2: 3 layers, 2 row tiles; exercise both the VMEM-resident-A path
    # (strict f32) and the streamed-A fallback (bf16).
    x2, ei2, params2 = make_case(k2, 200, 24, 48, 6, 3, 400)
    ref2_f32 = gnn_forward_ref(x2, ei2, params2, a_dtype=jnp.float32)
    ref2_bf16 = gnn_forward_ref(x2, ei2, params2, a_dtype=jnp.bfloat16)

    out2_res = jax.block_until_ready(
        gnn_forward(x2, ei2, params2, a_dtype=jnp.float32, tm=128, a_resident=True))
    assert out2_res.shape == (200, 6)
    assert jnp.allclose(out2_res, ref2_f32, atol=5e-3, rtol=5e-3), \
        "f32 mismatch (case 2, resident A)"

    out2_str = jax.block_until_ready(
        gnn_forward(x2, ei2, params2, a_dtype=jnp.bfloat16, tm=128, a_resident=False))
    assert jnp.allclose(out2_str, ref2_bf16, atol=5e-2, rtol=5e-2), \
        "bf16 mismatch (case 2, streamed A)"

    print("KERNEL_OK")
</pallas_src>

<mosaic_0001>
module attributes {stable_mosaic.version = 11 : i64} {
  func.func @_fused_gcn_kernel(%arg0: i32, %arg1: i32, %arg2: memref<128x128xf32, #tpu.memory_space<any>>, %arg3: memref<128x128xf32, #tpu.memory_space<any>>, %arg4: memref<1x128x128xf32, #tpu.memory_space<vmem>>, %arg5: memref<1x1x128xf32, #tpu.memory_space<vmem>>, %arg6: memref<128x128xf32, #tpu.memory_space<vmem>>, %arg7: memref<128x128xf32, #tpu.memory_space<vmem>>, %arg8: memref<128x128xf32, #tpu.memory_space<vmem>>, %arg9: memref<2x!tpu.dma_semaphore, #tpu.memory_space<semaphore_mem>>, %arg10: memref<128x128xf32, #tpu.memory_space<vmem>>) attributes {dimension_semantics = [#tpu.dimension_semantics<arbitrary>, #tpu.dimension_semantics<arbitrary>], iteration_bounds = array<i64: 2, 1>, scalar_prefetch = 0 : i64, scratch_operands = 4 : i64, tpu.core_type = #tpu.core_type<tc>, window_params = [{}, {}, {transform_indices = @transform_2, window_bounds = array<i64: 1, 128, 128>}, {transform_indices = @transform_3, window_bounds = array<i64: 1, 1, 128>}, {transform_indices = @transform_4, window_bounds = array<i64: 128, 128>}]} {
    %c0_i32 = arith.constant 0 : i32
    %0 = arith.cmpi eq, %arg0, %c0_i32 : i32
    %c0_i32_0 = arith.constant 0 : i32
    %1 = arith.cmpi eq, %arg1, %c0_i32_0 : i32
    %2 = arith.andi %0, %1 : i1
    %3 = arith.extui %2 : i1 to i32
    %c0_i32_1 = arith.constant 0 : i32
    %4 = arith.cmpi ne, %3, %c0_i32_1 : i32
    scf.if %4 {
      %c0_i32_9 = arith.constant 0 : i32
      %21 = tpu.memref_slice %arg9[%c0_i32_9] : memref<2x!tpu.dma_semaphore, #tpu.memory_space<semaphore_mem>> -> memref<1x!tpu.dma_semaphore, #tpu.memory_space<semaphore_mem>>
      %22 = tpu.memref_squeeze %21 : memref<1x!tpu.dma_semaphore, #tpu.memory_space<semaphore_mem>> -> memref<!tpu.dma_semaphore, #tpu.memory_space<semaphore_mem>>
      tpu.enqueue_dma source(%arg3 : memref<128x128xf32, #tpu.memory_space<any>>) target(%arg7 : memref<128x128xf32, #tpu.memory_space<vmem>>) target_semaphore(%22 : memref<!tpu.dma_semaphore, #tpu.memory_space<semaphore_mem>>)
      %c1_i32_10 = arith.constant 1 : i32
      %23 = tpu.memref_slice %arg9[%c1_i32_10] : memref<2x!tpu.dma_semaphore, #tpu.memory_space<semaphore_mem>> -> memref<1x!tpu.dma_semaphore, #tpu.memory_space<semaphore_mem>>
      %24 = tpu.memref_squeeze %23 : memref<1x!tpu.dma_semaphore, #tpu.memory_space<semaphore_mem>> -> memref<!tpu.dma_semaphore, #tpu.memory_space<semaphore_mem>>
      tpu.enqueue_dma source(%arg2 : memref<128x128xf32, #tpu.memory_space<any>>) target(%arg10 : memref<128x128xf32, #tpu.memory_space<vmem>>) target_semaphore(%24 : memref<!tpu.dma_semaphore, #tpu.memory_space<semaphore_mem>>)
      %c1_i32_11 = arith.constant 1 : i32
      %25 = tpu.memref_slice %arg9[%c1_i32_11] : memref<2x!tpu.dma_semaphore, #tpu.memory_space<semaphore_mem>> -> memref<1x!tpu.dma_semaphore, #tpu.memory_space<semaphore_mem>>
      %26 = tpu.memref_squeeze %25 : memref<1x!tpu.dma_semaphore, #tpu.memory_space<semaphore_mem>> -> memref<!tpu.dma_semaphore, #tpu.memory_space<semaphore_mem>>
      tpu.wait_dma2 semaphore(%26 : memref<!tpu.dma_semaphore, #tpu.memory_space<semaphore_mem>>) src(%arg2 : memref<128x128xf32, #tpu.memory_space<any>>) dst(%arg10 : memref<128x128xf32, #tpu.memory_space<vmem>>)
      %c0_i32_12 = arith.constant 0 : i32
      %27 = tpu.memref_slice %arg9[%c0_i32_12] : memref<2x!tpu.dma_semaphore, #tpu.memory_space<semaphore_mem>> -> memref<1x!tpu.dma_semaphore, #tpu.memory_space<semaphore_mem>>
      %28 = tpu.memref_squeeze %27 : memref<1x!tpu.dma_semaphore, #tpu.memory_space<semaphore_mem>> -> memref<!tpu.dma_semaphore, #tpu.memory_space<semaphore_mem>>
      tpu.wait_dma2 semaphore(%28 : memref<!tpu.dma_semaphore, #tpu.memory_space<semaphore_mem>>) src(%arg3 : memref<128x128xf32, #tpu.memory_space<any>>) dst(%arg7 : memref<128x128xf32, #tpu.memory_space<vmem>>)
    } else {
    }
    %c128_i32 = arith.constant 128 : i32
    %5 = arith.muli %arg1, %c128_i32 : i32
    %6 = tpu.assume_multiple %5, 128 : i32
    %7 = arith.index_cast %6 : i32 to index
    %c0 = arith.constant 0 : index
    %8 = vector.load %arg10[%7, %c0] : memref<128x128xf32, #tpu.memory_space<vmem>>, vector<128x128xf32>
    %c0_2 = arith.constant 0 : index
    %c0_3 = arith.constant 0 : index
    %9 = vector.load %arg7[%c0_2, %c0_3] : memref<128x128xf32, #tpu.memory_space<vmem>>, vector<128x128xf32>
    %cst = arith.constant dense<0.000000e+00> : vector<128x128xf32>
    %10 = tpu.matmul %8, %9, %cst {dimension_numbers = #tpu.dot_dimension_numbers<[1], [0], [0], [1], [0, 0, 1, 1], [], []>} : vector<128x128xf32>, vector<128x128xf32>, vector<128x128xf32> -> vector<128x128xf32>
    %c0_4 = arith.constant 0 : index
    %c0_5 = arith.constant 0 : index
    %c0_6 = arith.constant 0 : index
    %11 = vector.load %arg5[%c0_4, %c0_5, %c0_6] : memref<1x1x128xf32, #tpu.memory_space<vmem>>, vector<1x1x128xf32>
    %12 = vector.shape_cast %11 : vector<1x1x128xf32> to vector<1x128xf32>
    %13 = vector.broadcast %12 : vector<1x128xf32> to vector<128x128xf32>
    %14 = arith.addf %10, %13 : vector<128x128xf32>
    %c1_i32 = arith.constant 1 : i32
    %15 = arith.cmpi eq, %arg0, %c1_i32 : i32
    %true = arith.constant true
    %16 = arith.xori %15, %true : i1
    %17 = arith.extui %16 : i1 to i32
    %c0_i32_7 = arith.constant 0 : i32
    %18 = arith.cmpi ne, %17, %c0_i32_7 : i32
    scf.if %18 {
      %cst_9 = arith.constant 0.000000e+00 : f32
      %21 = vector.broadcast %cst_9 : f32 to vector<128x128xf32>
      %22 = arith.maximumf %14, %21 : vector<128x128xf32>
      %c0_10 = arith.constant 0 : index
      %c0_11 = arith.constant 0 : index
      %c0_12 = arith.constant 0 : index
      %23 = vector.load %arg4[%c0_10, %c0_11, %c0_12] : memref<1x128x128xf32, #tpu.memory_space<vmem>>, vector<1x128x128xf32>
      %24 = vector.shape_cast %23 : vector<1x128x128xf32> to vector<128x128xf32>
      %cst_13 = arith.constant dense<0.000000e+00> : vector<128x128xf32>
      %25 = tpu.matmul %22, %24, %cst_13 {dimension_numbers = #tpu.dot_dimension_numbers<[1], [0], [0], [1], [0, 0, 1, 1], [], []>} : vector<128x128xf32>, vector<128x128xf32>, vector<128x128xf32> -> vector<128x128xf32>
      %26 = arith.index_cast %6 : i32 to index
      %c0_14 = arith.constant 0 : index
      %27 = vector.load %arg8[%26, %c0_14] : memref<128x128xf32, #tpu.memory_space<vmem>>, vector<128x128xf32>
      tpu.vector_store %arg8[%26, %c0_14], %25 {strides = array<i32>} : memref<128x128xf32, #tpu.memory_space<vmem>>, vector<128x128xf32>,
      %c0_i32_15 = arith.constant 0 : i32
      %28 = arith.cmpi eq, %arg1, %c0_i32_15 : i32
      %29 = arith.extui %28 : i1 to i32
      %c0_i32_16 = arith.constant 0 : i32
      %30 = arith.cmpi ne, %29, %c0_i32_16 : i32
      scf.if %30 {
        %c0_17 = arith.constant 0 : index
        %c0_18 = arith.constant 0 : index
        %31 = vector.load %arg8[%c0_17, %c0_18] : memref<128x128xf32, #tpu.memory_space<vmem>>, vector<128x128xf32>
        %c0_19 = arith.constant 0 : index
        %c0_20 = arith.constant 0 : index
        %32 = vector.load %arg7[%c0_19, %c0_20] : memref<128x128xf32, #tpu.memory_space<vmem>>, vector<128x128xf32>
        tpu.vector_store %arg7[%c0_19, %c0_20], %31 {strides = array<i32>} : memref<128x128xf32, #tpu.memory_space<vmem>>, vector<128x128xf32>,
      } else {
      }
    } else {
    }
    %19 = arith.extui %15 : i1 to i32
    %c0_i32_8 = arith.constant 0 : i32
    %20 = arith.cmpi ne, %19, %c0_i32_8 : i32
    scf.if %20 {
      %21 = tpu.iota {dimensions = array<i32: 1>} : vector<128x128xi32>
      %c8_i32 = arith.constant 8 : i32
      %22 = vector.broadcast %c8_i32 : i32 to vector<128x128xi32>
      %23 = arith.cmpi slt, %21, %22 : vector<128x128xi32>
      %cst_9 = arith.constant 0xFF800000 : f32
      %24 = vector.broadcast %cst_9 : f32 to vector<128x128xf32>
      %25 = arith.select %23, %14, %24 : vector<128x128xi1>, vector<128x128xf32>
      %cst_10 = arith.constant dense<0xFF800000> : vector<128xf32>
      %26 = vector.multi_reduction <maximumf>, %25, %cst_10 [1] : vector<128x128xf32> to vector<128xf32>
      %27 = vector.shape_cast %26 : vector<128xf32> to vector<128x1xf32>
      %28 = vector.broadcast %27 : vector<128x1xf32> to vector<128x128xf32>
      %29 = arith.subf %25, %28 : vector<128x128xf32>
      %30 = math.exp %29 : vector<128x128xf32>
      %cst_11 = arith.constant dense<0.000000e+00> : vector<128xf32>
      %31 = vector.multi_reduction <add>, %30, %cst_11 [1] : vector<128x128xf32> to vector<128xf32>
      %32 = vector.shape_cast %31 : vector<128xf32> to vector<128x1xf32>
      %33 = math.log %32 : vector<128x1xf32>
      %34 = vector.broadcast %33 : vector<128x1xf32> to vector<128x128xf32>
      %35 = arith.subf %29, %34 : vector<128x128xf32>
      %cst_12 = arith.constant 0.000000e+00 : f32
      %36 = vector.broadcast %cst_12 : f32 to vector<128x128xf32>
      %37 = arith.select %23, %35, %36 : vector<128x128xi1>, vector<128x128xf32>
      %c0_13 = arith.constant 0 : index
      %c0_14 = arith.constant 0 : index
      %38 = vector.load %arg6[%c0_13, %c0_14] : memref<128x128xf32, #tpu.memory_space<vmem>>, vector<128x128xf32>
      tpu.vector_store %arg6[%c0_13, %c0_14], %37 {strides = array<i32>} : memref<128x128xf32, #tpu.memory_space<vmem>>, vector<128x128xf32>,
    } else {
    }
    return
  }
  func.func @transform_2(%arg0: i32, %arg1: i32) -> (i32, i32, i32) {
    %c0_i32 = arith.constant 0 : i32
    %0 = arith.minsi %arg0, %c0_i32 : i32
    %c0_i32_0 = arith.constant 0 : i32
    %c0_i32_1 = arith.constant 0 : i32
    %c0_i32_2 = arith.constant 0 : i32
    return %0, %c0_i32_0, %c0_i32_1 : i32, i32, i32
  }
  func.func @transform_3(%arg0: i32, %arg1: i32) -> (i32, i32, i32) {
    %c0_i32 = arith.constant 0 : i32
    %c0_i32_0 = arith.constant 0 : i32
    %c0_i32_1 = arith.constant 0 : i32
    return %arg0, %c0_i32, %c0_i32_0 : i32, i32, i32
  }
  func.func @transform_4(%arg0: i32, %arg1: i32) -> (i32, i32) {
    %c1_i32 = arith.constant 1 : i32
    %0 = arith.cmpi eq, %arg0, %c1_i32 : i32
    %c0_i32 = arith.constant 0 : i32
    %1 = arith.select %0, %arg1, %c0_i32 : i32
    %c0_i32_0 = arith.constant 0 : i32
    %c0_i32_1 = arith.constant 0 : i32
    return %1, %c0_i32_0 : i32, i32
  }
}

</mosaic_0001>

<bundles_post_ra>
// kernel: tpu_custom_call.1
= control target key start
LH: loop header
LB: loop body
LE: loop exit
PB: predicated region body
PF: predicated region fallthrough
CT: control target
= control target key end

     0   :  { %9 = vsyncpa [#allocation7], 0  ;;  %s1955_s0 = inlined_call_operand.hbm [shape: f32[128,128], index: 0, kind: input, shape index: {}]   ;;  %s1956_s1 = inlined_call_operand.hbm [shape: f32[128,128], index: 1, kind: input, shape index: {}]   ;;  %s1957_s2 = inlined_call_operand.hbm [shape: f32[1,128,128], index: 2, kind: input, shape index: {}]   ;;  %s1958_s3 = inlined_call_operand.vmem [shape: f32[2,1,128], index: 3, kind: input, shape index: {}]   ;;  %s1959_s4 = inlined_call_operand.hbm [shape: f32[128,128], index: 4, kind: output, shape index: {}]  }
   0x1   :  { %11 = vsyncpa [#allocation7 + $0x1], 0 }
   0x2   :  { %12 = vsyncpa [#allocation8], 0 }
   0x3   :  { %14 = vsyncpa [#allocation8 + $0x1], 0  ;;  %s1592_s15 = smov 0   ;;  %s1594_s16 = smov 0  }
   0x4   :  { %s1596_s17 = smov 0   ;;  %s1598_s18 = smov 0  }
   0x5   :  { %s1600_s19 = smov 0  }
   0x6 LB: > { %s996_s20 = sadd.s32 4294967295, %s1557_s19   ;;  %s997_s21 = sadd.s32 4294967294, %s1557_s19   ;;  %s1557_s19 = sphi %s1600_s19, %s20_s19   ;;  %s1553_s18 = sphi %s1598_s18, %s1969_s18   ;;  %s1549_s17 = sphi %s1596_s17, %s1968_s17   ;;  %s1545_s16 = sphi %s1594_s16, %s1945_s16   ;;  %s1541_s15 = sphi %s1592_s15, %s1967_s15  }
   0x7   : > { %s32_s22 = sadd.s32 1, %s1553_s18  ;;  %p1538_p1 = scmp.ne.s32.totalorder %s1545_s16, 0 }
   0x8   : > { %p34_p0 = scmp.ge.s32.totalorder %s32_s22, 2  ;;  %p51_p2 = scmp.eq.s32.totalorder %s1557_s19, 0 }
   0x9   : > { %p56_p3 = scmp.ne.s32.totalorder %s1545_s16, %s1541_s15  ;;  %p57_p5 = scmp.eq.s32.totalorder %s996_s20, 0 }
   0xa   : > { %s1971_s22 = smov (%p34_p0, %s32_s22), 0  ;;  %p52_p4 = por %p1538_p1, %p51_p2 }
   0xb   : > { %p1625_p6 = por %p57_p5, %p56_p3  ;;  %p1275_p8 = scmp.lt.s32.totalorder %s1557_s19, 2 }
   0xc   : > { %s1559_s24 = smov [#allocation6]   ;;  %s1398_s29 = scalar_lea.hbm %s1957_s2, 2048 }
   0xd   : > { %s1961_s23 = scalar_select %p1625_p6, 1, 0 }
   0xe   : > { %s149_s25 = sshll.u32 %s1559_s24, 4  ;;  %p1631_p9 = pnand %p1275_p8, %p52_p4  ;;  %s150_s25 = int_to_ptr.vmem [resolvable:$true] %s149_s25 }
   0xf   : > { %p1399_p11 = scmp.ne.s32.totalorder %s1957_s2, %s1398_s29  ;;  %p1405_p1 = scmp.lt.s32.totalorder %s1398_s29, %s1398_s29 }
  0x10   : > { %p1400_p12 = pneg %p1631_p9 }
  0x12   : > { %p1401_p13 = pnand %p1400_p12, %p1399_p11 }
  0x14   : > { %p1402_p0 = pneg %p1401_p13 }
  0x16   : > { %p1407_p2 = pnand %p1405_p1, %p1402_p0 }
  0x18   : > { %1410 = shalt.err (!%p1407_p2)
}
  0x19   : > { %s1411_s6 = scalar_lea.vmem %s150_s25, 2048  ;;  %s1418_s7 = scalar_lea.vmem %s150_s25, 4096 }
  0x1a   : > { %p1412_p3 = scmp.ne.s32.totalorder %s150_s25, %s1411_s6  ;;  %p1419_p8 = scmp.lt.s32.totalorder %s150_s25, %s150_s25 }
  0x1b   : > { %p1420_p7 = scmp.lt.s32.totalorder %s1418_s7, %s1411_s6 }
  0x1c   : > { %p1414_p4 = pnand %p1412_p3, %p1400_p12 }
  0x1d   : > { %p1421_p10 = por %p1420_p7, %p1419_p8 }
  0x1e   : > { %p1415_p5 = pneg %p1414_p4 }
  0x20   : > { %p1422_p6 = pnand %p1421_p10, %p1415_p5 }
  0x22   : > { %1425 = shalt.err (!%p1422_p6)
}
  0x23   : > { %s1560_s8 = smov 128   ;;  %s1561_s9 = smov 8  }
  0x24   : > { %1270 = dma.hbm_to_vmem [thread:$0]  (!%p1631_p9), %s1957_s2, 2048, %s150_s25, [#allocation7], %s1560_s8, %s1560_s8, %s1561_s9  }
  0x25   : > { %p163_p11 = scmp.lt.s32.totalorder %s1557_s19, 3  ;;  %p1963_p13 = scmp.ge.s32.totalorder %s1557_s19, 1 }
  0x27   : > { %p164_p12 = pnand %p1963_p13, %p163_p11 }
  0x28   : > { %s169_s12 = sand.u32 (!%p164_p12), 1, %s1545_s16   ;;  %p1964_p6 = scmp.ne.s32.totalorder (!%p164_p12), %s1961_s23, 0 }
  0x29   : > { %167 = sbr.rel (%p164_p12) target bundleno = 933 (0x3a5), region = 28  ;;  %s1004_s13 = sshll.u32 (!%p164_p12), %s169_s12, 7 }
  0x2a   : > { %s170_s14 = scalar_lea.sflag (!%p164_p12), [#allocation7], %s169_s12  ;;  %s1653_s15 = scalar_lea.vmem (!%p164_p12), [#allocation6], %s1004_s13 }
  0x2e   : > { %1523 = dma.done.wait (%p1964_p6), %s170_s14, 2048  }
  0x2f   : > { %1525 = vsyncadd (%p1964_p6), %s170_s14, 4294965248  ;;  %p199_p7 = scmp.lt.s32.totalorder %s1549_s17, 1  ;;  %p205_p9 = scmp.eq.s32.totalorder %s1549_s17, 0 }
  0x30   : > { %s1562_s25 = smov [#allocation2]   ;;  %s1563_s27 = smov [#allocation5]  }
  0x31   : > { %s1662_s24 = scalar_select %p199_p7, %s1549_s17, 1 }
  0x32   : > { %s218_s26 = sshll.u32 %s1562_s25, 4  ;;  %s230_s28 = sshll.u32 %s1563_s27, 4  ;;  %s219_s26 = int_to_ptr.vmem [resolvable:$true] %s218_s26  ;;  %s231_s28 = int_to_ptr.vmem [resolvable:$true] %s230_s28 }
  0x33   : > { %s201_s5 = scalar_lea.vmem %s1958_s3, %s1662_s24  ;;  %s1436_s23 = scalar_lea.vmem %s219_s26, 2048 }
  0x34   : > { %p1437_p10 = scmp.ne.s32.totalorder %s219_s26, %s1436_s23  ;;  %p1443_p2 = scmp.lt.s32.totalorder %s219_s26, %s219_s26 }
  0x35   : > { %p1444_p3 = scmp.lt.s32.totalorder %s1436_s23, %s1436_s23 }
  0x36   : > { %p1438_p0 = pnand %p1437_p10, %p205_p9 }
  0x37   : > { %p1445_p4 = por %p1444_p3, %p1443_p2 }
  0x38   : > { %p1439_p1 = pneg %p1438_p0 }
  0x3a   : > { %p1446_p5 = pnand %p1445_p4, %p1439_p1 }
  0x3c   : > { %1449 = shalt.err (!%p1446_p5)  }
  0x3d   : > { %1259 = dma.hbm_to_vmem [thread:$0]  (%p205_p9), %s1956_s1, 2048, %s219_s26, [#allocation4] }
  0x3e   : > { %s1460_s8 = scalar_lea.vmem %s231_s28, 2048  ;;  %p1467_p12 = scmp.lt.s32.totalorder %s231_s28, %s231_s28 }
  0x3f   : > { %p1461_p8 = scmp.ne.s32.totalorder %s231_s28, %s1460_s8  ;;  %p1468_p6 = scmp.lt.s32.totalorder %s1460_s8, %s1460_s8 }
  0x41   : > { %p1462_p11 = pnand %p1461_p8, %p205_p9  ;;  %p1469_p7 = por %p1468_p6, %p1467_p12 }
  0x43   : > { %p1463_p13 = pneg %p1462_p11 }
  0x45   : > { %p1470_p10 = pnand %p1469_p7, %p1463_p13 }
  0x47   : > { %1473 = shalt.err (!%p1470_p10)  }
  0x48   : > { %1260 = dma.hbm_to_vmem [thread:$0]  (%p205_p9), %s1955_s0, 2048, %s231_s28, [#allocation4 + $0x1] }
  0x49   : > { %1527 = dma.done.wait (%p205_p9), [#allocation4 + $0x1], 2048 }
  0x4a   : > { %1529 = vsyncadd (%p205_p9), [#allocation4 + $0x1], 4294965248 }
  0x4b   : > { %1531 = dma.done.wait (%p205_p9), [#allocation4], 2048 }
  0x4c   : > { %1533 = vsyncadd (%p205_p9), [#allocation4], 4294965248  ;;  %v272_v0 = vld [vmem:[#allocation2 + $0x78] sm:$0xff]  ;;  %v271_v1 = vld [vmem:[#allocation2 + $0x70] sm:$0xff]  ;;  %p1007_p9 = scmp.eq.s32.totalorder %s1549_s17, 1 }
  0x4d   : > { %1081 = vmatprep.subr.mxu0 %v272_v0  ;;  %1193 = vmatprep.subr.mxu1 %v272_v0  ;;  %v270_v2 = vld [vmem:[#allocation2 + $0x68] sm:$0xff]  ;;  %v269_v3 = vld [vmem:[#allocation2 + $0x60] sm:$0xff]  ;;  %v268_v4 = vld [vmem:[#allocation2 + $0x58] sm:$0xff] }
  0x4e   : > { %1082 = vmatpush3.msra.mxu0 %v272_v0  ;;  %1209 = vmatpush3.msra.mxu1 %v272_v0  ;;  %v267_v5 = vld [vmem:[#allocation2 + $0x50] sm:$0xff]  ;;  %v266_v6 = vld [vmem:[#allocation2 + $0x48] sm:$0xff]  ;;  %v265_v7 = vld [vmem:[#allocation2 + $0x40] sm:$0xff] }
  0x4f   : > { %1083 = vmatprep.subr.mxu0 %v271_v1  ;;  %1194 = vmatprep.subr.mxu1 %v271_v1  ;;  %v264_v8 = vld [vmem:[#allocation2 + $0x38] sm:$0xff]  ;;  %v263_v9 = vld [vmem:[#allocation2 + $0x30] sm:$0xff]  ;;  %v262_v10 = vld [vmem:[#allocation2 + $0x28] sm:$0xff] }
  0x50   : > { %1084 = vmatpush3.msra.mxu0 %v271_v1  ;;  %1210 = vmatpush3.msra.mxu1 %v271_v1  ;;  %v261_v11 = vld [vmem:[#allocation2 + $0x20] sm:$0xff]  ;;  %v260_v12 = vld [vmem:[#allocation2 + $0x18] sm:$0xff]  ;;  %v259_v13 = vld [vmem:[#allocation2 + $0x10] sm:$0xff] }
  0x51   : > { %1085 = vmatprep.subr.mxu0 %v270_v2  ;;  %1195 = vmatprep.subr.mxu1 %v270_v2  ;;  %v258_v14 = vld [vmem:[#allocation2 + $0x8] sm:$0xff]  ;;  %v257_v15 = vld [vmem:[#allocation2] sm:$0xff]  ;;  %v243_v20 = vld [vmem:[#allocation5 + $0x10] sm:$0xff] }
  0x52   : > { %1086 = vmatpush3.msra.mxu0 %v270_v2  ;;  %1211 = vmatpush3.msra.mxu1 %v270_v2  ;;  %v241_v16 = vld [vmem:[#allocation5] sm:$0xff]  ;;  %v242_v18 = vld [vmem:[#allocation5 + $0x8] sm:$0xff]  ;;  %v251_v21 = vld [vmem:[#allocation5 + $0x50] sm:$0xff] }
  0x53   : > { %1087 = vmatprep.subr.mxu0 %v269_v3  ;;  %1196 = vmatprep.subr.mxu1 %v269_v3  ;;  %v249_v17 = vld [vmem:[#allocation5 + $0x40] sm:$0xff]  ;;  %v250_v19 = vld [vmem:[#allocation5 + $0x48] sm:$0xff]  ;;  %v244_v22 = vld [vmem:[#allocation5 + $0x18] sm:$0xff] }
  0x54   : > { %1088 = vmatpush3.msra.mxu0 %v269_v3  ;;  %1212 = vmatpush3.msra.mxu1 %v269_v3  ;;  %v252_v23 = vld [vmem:[#allocation5 + $0x58] sm:$0xff]  ;;  %v245_v24 = vld [vmem:[#allocation5 + $0x20] sm:$0xff]  ;;  %v246_v26 = vld [vmem:[#allocation5 + $0x28] sm:$0xff] }
  0x55   : > { %1089 = vmatprep.subr.mxu0 %v268_v4  ;;  %1197 = vmatprep.subr.mxu1 %v268_v4  ;;  %v253_v25 = vld [vmem:[#allocation5 + $0x60] sm:$0xff]  ;;  %v254_v27 = vld [vmem:[#allocation5 + $0x68] sm:$0xff]  ;;  %v247_v28 = vld [vmem:[#allocation5 + $0x30] sm:$0xff] }
  0x56   : > { %1090 = vmatpush3.msra.mxu0 %v268_v4  ;;  %1213 = vmatpush3.msra.mxu1 %v268_v4  ;;  %v255_v29 = vld [vmem:[#allocation5 + $0x70] sm:$0xff]  ;;  %v248_v30 = vld [vmem:[#allocation5 + $0x38] sm:$0xff]  ;;  %v1006_v32 = vld [vmem:[%s201_s5] ss:$0 sm:$0xff] }
  0x57   : > { %1091 = vmatprep.subr.mxu0 %v267_v5  ;;  %1198 = vmatprep.subr.mxu1 %v267_v5  ;;  %v256_v31 = vld [vmem:[#allocation5 + $0x78] sm:$0xff] }
  0x58   : > { %1092 = vmatpush3.msra.mxu0 %v267_v5  ;;  %1214 = vmatpush3.msra.mxu1 %v267_v5 }
  0x59   : > { %1093 = vmatprep.subr.mxu0 %v266_v6  ;;  %1199 = vmatprep.subr.mxu1 %v266_v6 }
  0x5a   : > { %1094 = vmatpush3.msra.mxu0 %v266_v6  ;;  %1215 = vmatpush3.msra.mxu1 %v266_v6 }
  0x5b   : > { %1095 = vmatprep.subr.mxu0 %v265_v7  ;;  %1200 = vmatprep.subr.mxu1 %v265_v7 }
  0x5c   : > { %1096 = vmatpush3.msra.mxu0 %v265_v7  ;;  %1216 = vmatpush3.msra.mxu1 %v265_v7 }
  0x5d   : > { %1097 = vmatprep.subr.mxu0 %v264_v8  ;;  %1201 = vmatprep.subr.mxu1 %v264_v8 }
  0x5e   : > { %1098 = vmatpush3.msra.mxu0 %v264_v8  ;;  %1217 = vmatpush3.msra.mxu1 %v264_v8 }
  0x5f   : > { %1099 = vmatprep.subr.mxu0 %v263_v9  ;;  %1202 = vmatprep.subr.mxu1 %v263_v9 }
  0x60   : > { %1100 = vmatpush3.msra.mxu0 %v263_v9  ;;  %1218 = vmatpush3.msra.mxu1 %v263_v9 }
  0x61   : > { %1101 = vmatprep.subr.mxu0 %v262_v10  ;;  %1203 = vmatprep.subr.mxu1 %v262_v10 }
  0x62   : > { %1102 = vmatpush3.msra.mxu0 %v262_v10  ;;  %1219 = vmatpush3.msra.mxu1 %v262_v10 }
  0x63   : > { %1103 = vmatprep.subr.mxu0 %v261_v11  ;;  %1204 = vmatprep.subr.mxu1 %v261_v11 }
  0x64   : > { %1104 = vmatpush3.msra.mxu0 %v261_v11  ;;  %1220 = vmatpush3.msra.mxu1 %v261_v11 }
  0x65   : > { %1105 = vmatprep.subr.mxu0 %v260_v12  ;;  %1205 = vmatprep.subr.mxu1 %v260_v12 }
  0x66   : > { %1106 = vmatpush3.msra.mxu0 %v260_v12  ;;  %1221 = vmatpush3.msra.mxu1 %v260_v12 }
  0x67   : > { %1107 = vmatprep.subr.mxu0 %v259_v13  ;;  %1206 = vmatprep.subr.mxu1 %v259_v13 }
  0x68   : > { %1108 = vmatpush3.msra.mxu0 %v259_v13  ;;  %1222 = vmatpush3.msra.mxu1 %v259_v13 }
  0x69   : > { %1109 = vmatprep.subr.mxu0 %v258_v14  ;;  %1207 = vmatprep.subr.mxu1 %v258_v14 }
  0x6a   : > { %1110 = vmatpush3.msra.mxu0 %v258_v14  ;;  %1223 = vmatpush3.msra.mxu1 %v258_v14 }
  0x6b   : > { %1111 = vmatprep.subr.mxu0 %v257_v15  ;;  %1208 = vmatprep.subr.mxu1 %v257_v15 }
  0x6c   : > { %1112 = vmatpush3.msra.mxu0 %v257_v15  ;;  %1224 = vmatpush3.msra.mxu1 %v257_v15 }
  0x6d   : > { %1113 = vmatprep.mubr.f32.mxu0 %v241_v16  ;;  %1125 = vmatprep.mubr.f32.mxu1 %v249_v17 }
  0x6e   : > { %1114 = vmatmul.mubr.f32.vlgmr.msra.gmra.mxu0 %v242_v18  ;;  %1126 = vmatmul.mubr.f32.vlgmr.msra.gmra.mxu1 %v250_v19 }
  0x6f   : > { %1116 = vmatprep.mubr.f32.mxu0 %v243_v20  ;;  %1128 = vmatprep.mubr.f32.mxu1 %v251_v21 }
  0x72   : > { %1117 = vmatmul.mubr.f32.gmra.mxu0 %v244_v22  ;;  %1129 = vmatmul.mubr.f32.gmra.mxu1 %v252_v23 }
  0x73   : > { %1119 = vmatprep.mubr.f32.mxu0 %v245_v24  ;;  %1131 = vmatprep.mubr.f32.mxu1 %v253_v25 }
  0x76   : > { %1120 = vmatmul.mubr.f32.gmra.mxu0 %v246_v26  ;;  %1132 = vmatmul.mubr.f32.gmra.mxu1 %v254_v27 }
  0x77   : > { %1122 = vmatprep.mubr.f32.mxu0 %v247_v28  ;;  %1134 = vmatprep.mubr.f32.mxu1 %v255_v29 }
  0x7a   : > { %1123 = vmatmul.mubr.f32.gmra.mxu0 %v248_v30  ;;  %1135 = vmatmul.mubr.f32.gmra.mxu1 %v256_v31 }
 0x12e   : > { %v1115_v33 = vpop.f32.mrf.mxu0  ;;  %v1127_v34 = vpop.f32.mrf.mxu1 }
 0x12f   : > { %v1695_v35 = vadd.f32 %v1115_v33, %v1006_v32  ;;  %v1697_v36 = vadd.f32 %v1127_v34, %v1006_v32 }
 0x130   : > { %v346_v37 = vpop.f32.mrf.mxu0  ;;  %v386_v38 = vpop.f32.mrf.mxu1 }
 0x131   : > { %v1699_v39 = vadd.f32 %v1006_v32, %v346_v37  ;;  %v1701_v40 = vadd.f32 %v1006_v32, %v386_v38 }
 0x132   : > { %v1118_v41 = vpop.f32.mrf.mxu0  ;;  %v1130_v42 = vpop.f32.mrf.mxu1 }
 0x133   : > { %v1703_v43 = vadd.f32 %v1118_v41, %v1006_v32  ;;  %v1705_v44 = vadd.f32 %v1130_v42, %v1006_v32 }
 0x134   : > { %v356_v45 = vpop.f32.mrf.mxu0  ;;  %v396_v46 = vpop.f32.mrf.mxu1 }
 0x135   : > { %v1707_v47 = vadd.f32 %v1006_v32, %v356_v45  ;;  %v1709_v48 = vadd.f32 %v1006_v32, %v396_v46 }
 0x136   : > { %v1121_v49 = vpop.f32.mrf.mxu0  ;;  %v1133_v50 = vpop.f32.mrf.mxu1 }
 0x137   : > { %v1711_v51 = vadd.f32 %v1121_v49, %v1006_v32  ;;  %v1713_v52 = vadd.f32 %v1133_v50, %v1006_v32 }
 0x138   : > { %v366_v53 = vpop.f32.mrf.mxu0  ;;  %v406_v54 = vpop.f32.mrf.mxu1 }
 0x139   : > { %v1715_v55 = vadd.f32 %v1006_v32, %v366_v53  ;;  %v1717_v56 = vadd.f32 %v1006_v32, %v406_v54  ;;  %429 = sbr.rel (%p1007_p9) target bundleno = 560 (0x230), region = 48 }
 0x13a   : > { %v1124_v57 = vpop.f32.mrf.mxu0  ;;  %v1136_v58 = vpop.f32.mrf.mxu1 }
 0x13b   : > { %v1719_v59 = vadd.f32 %v1124_v57, %v1006_v32  ;;  %v1721_v60 = vadd.f32 %v1136_v58, %v1006_v32 }
 0x13c   : > { %v376_v61 = vpop.f32.mrf.mxu0  ;;  %v416_v62 = vpop.f32.mrf.mxu1 }
 0x13d   : > { %v1723_v63 = vadd.f32 %v1006_v32, %v376_v61  ;;  %v1725_v0 = vadd.f32 %v1006_v32, %v416_v62 }
 0x13e   : > { %v461_v1 = vld [vmem:[%s1653_s15 + $0x78] sm:$0xff]  ;;  %v460_v2 = vld [vmem:[%s1653_s15 + $0x70] sm:$0xff]  ;;  %v459_v3 = vld [vmem:[%s1653_s15 + $0x68] sm:$0xff]  ;;  %v430_v17 = vmax.f32 %v1699_v39, 0.0  ;;  %v438_v18 = vmax.f32 %v1701_v40, 0.0  ;;  %v431_v19 = vmax.f32 %v1695_v35, 0.0 }
 0x13f   : > { %1137 = vmatprep.subr.mxu0 %v461_v1  ;;  %1225 = vmatprep.subr.mxu1 %v461_v1  ;;  %v458_v4 = vld [vmem:[%s1653_s15 + $0x60] sm:$0xff]  ;;  %v457_v5 = vld [vmem:[%s1653_s15 + $0x58] sm:$0xff]  ;;  %v456_v6 = vld [vmem:[%s1653_s15 + $0x50] sm:$0xff]  ;;  %v439_v20 = vmax.f32 %v1697_v36, 0.0  ;;  %v432_v21 = vmax.f32 %v1707_v47, 0.0  ;;  %v440_v22 = vmax.f32 %v1709_v48, 0.0 }
 0x140   : > { %1138 = vmatpush3.msra.mxu0 %v461_v1  ;;  %1241 = vmatpush3.msra.mxu1 %v461_v1  ;;  %v455_v7 = vld [vmem:[%s1653_s15 + $0x48] sm:$0xff]  ;;  %v454_v8 = vld [vmem:[%s1653_s15 + $0x40] sm:$0xff]  ;;  %v453_v9 = vld [vmem:[%s1653_s15 + $0x38] sm:$0xff]  ;;  %v433_v23 = vmax.f32 %v1703_v43, 0.0  ;;  %v441_v24 = vmax.f32 %v1705_v44, 0.0  ;;  %v434_v25 = vmax.f32 %v1715_v55, 0.0 }
 0x141   : > { %1139 = vmatprep.subr.mxu0 %v460_v2  ;;  %1226 = vmatprep.subr.mxu1 %v460_v2  ;;  %v452_v10 = vld [vmem:[%s1653_s15 + $0x30] sm:$0xff]  ;;  %v451_v11 = vld [vmem:[%s1653_s15 + $0x28] sm:$0xff]  ;;  %v450_v12 = vld [vmem:[%s1653_s15 + $0x20] sm:$0xff]  ;;  %v442_v26 = vmax.f32 %v1717_v56, 0.0  ;;  %v435_v27 = vmax.f32 %v1711_v51, 0.0  ;;  %v443_v28 = vmax.f32 %v1713_v52, 0.0 }
 0x142   : > { %1140 = vmatpush3.msra.mxu0 %v460_v2  ;;  %1242 = vmatpush3.msra.mxu1 %v460_v2  ;;  %v449_v13 = vld [vmem:[%s1653_s15 + $0x18] sm:$0xff]  ;;  %v448_v14 = vld [vmem:[%s1653_s15 + $0x10] sm:$0xff]  ;;  %v447_v15 = vld [vmem:[%s1653_s15 + $0x8] sm:$0xff]  ;;  %v436_v29 = vmax.f32 %v1723_v63, 0.0  ;;  %v444_v30 = vmax.f32 %v1725_v0, 0.0  ;;  %v437_v31 = vmax.f32 %v1719_v59, 0.0 }
 0x143   : > { %1141 = vmatprep.subr.mxu0 %v459_v3  ;;  %1227 = vmatprep.subr.mxu1 %v459_v3  ;;  %v446_v16 = vld [vmem:[%s1653_s15] sm:$0xff]  ;;  %v445_v32 = vmax.f32 %v1721_v60, 0.0 }
 0x144   : > { %1142 = vmatpush3.msra.mxu0 %v459_v3  ;;  %1243 = vmatpush3.msra.mxu1 %v459_v3 }
 0x145   : > { %1143 = vmatprep.subr.mxu0 %v458_v4  ;;  %1228 = vmatprep.subr.mxu1 %v458_v4 }
 0x146   : > { %1144 = vmatpush3.msra.mxu0 %v458_v4  ;;  %1244 = vmatpush3.msra.mxu1 %v458_v4 }
 0x147   : > { %1145 = vmatprep.subr.mxu0 %v457_v5  ;;  %1229 = vmatprep.subr.mxu1 %v457_v5 }
 0x148   : > { %1146 = vmatpush3.msra.mxu0 %v457_v5  ;;  %1245 = vmatpush3.msra.mxu1 %v457_v5 }
 0x149   : > { %1147 = vmatprep.subr.mxu0 %v456_v6  ;;  %1230 = vmatprep.subr.mxu1 %v456_v6 }
 0x14a   : > { %1148 = vmatpush3.msra.mxu0 %v456_v6  ;;  %1246 = vmatpush3.msra.mxu1 %v456_v6 }
 0x14b   : > { %1149 = vmatprep.subr.mxu0 %v455_v7  ;;  %1231 = vmatprep.subr.mxu1 %v455_v7 }
 0x14c   : > { %1150 = vmatpush3.msra.mxu0 %v455_v7  ;;  %1247 = vmatpush3.msra.mxu1 %v455_v7 }
 0x14d   : > { %1151 = vmatprep.subr.mxu0 %v454_v8  ;;  %1232 = vmatprep.subr.mxu1 %v454_v8 }
 0x14e   : > { %1152 = vmatpush3.msra.mxu0 %v454_v8  ;;  %1248 = vmatpush3.msra.mxu1 %v454_v8 }
 0x14f   : > { %1153 = vmatprep.subr.mxu0 %v453_v9  ;;  %1233 = vmatprep.subr.mxu1 %v453_v9 }
 0x150   : > { %1154 = vmatpush3.msra.mxu0 %v453_v9  ;;  %1249 = vmatpush3.msra.mxu1 %v453_v9 }
 0x151   : > { %1155 = vmatprep.subr.mxu0 %v452_v10  ;;  %1234 = vmatprep.subr.mxu1 %v452_v10 }
 0x152   : > { %1156 = vmatpush3.msra.mxu0 %v452_v10  ;;  %1250 = vmatpush3.msra.mxu1 %v452_v10 }
 0x153   : > { %1157 = vmatprep.subr.mxu0 %v451_v11  ;;  %1235 = vmatprep.subr.mxu1 %v451_v11 }
 0x154   : > { %1158 = vmatpush3.msra.mxu0 %v451_v11  ;;  %1251 = vmatpush3.msra.mxu1 %v451_v11 }
 0x155   : > { %1159 = vmatprep.subr.mxu0 %v450_v12  ;;  %1236 = vmatprep.subr.mxu1 %v450_v12 }
 0x156   : > { %1160 = vmatpush3.msra.mxu0 %v450_v12  ;;  %1252 = vmatpush3.msra.mxu1 %v450_v12 }
 0x157   : > { %1161 = vmatprep.subr.mxu0 %v449_v13  ;;  %1237 = vmatprep.subr.mxu1 %v449_v13 }
 0x158   : > { %1162 = vmatpush3.msra.mxu0 %v449_v13  ;;  %1253 = vmatpush3.msra.mxu1 %v449_v13 }
 0x159   : > { %1163 = vmatprep.subr.mxu0 %v448_v14  ;;  %1238 = vmatprep.subr.mxu1 %v448_v14 }
 0x15a   : > { %1164 = vmatpush3.msra.mxu0 %v448_v14  ;;  %1254 = vmatpush3.msra.mxu1 %v448_v14 }
 0x15b   : > { %1165 = vmatprep.subr.mxu0 %v447_v15  ;;  %1239 = vmatprep.subr.mxu1 %v447_v15 }
 0x15c   : > { %1166 = vmatpush3.msra.mxu0 %v447_v15  ;;  %1255 = vmatpush3.msra.mxu1 %v447_v15 }
 0x15d   : > { %1167 = vmatprep.subr.mxu0 %v446_v16  ;;  %1240 = vmatprep.subr.mxu1 %v446_v16 }
 0x15e   : > { %1168 = vmatpush3.msra.mxu0 %v446_v16  ;;  %1256 = vmatpush3.msra.mxu1 %v446_v16 }
 0x15f   : > { %1169 = vmatprep.mubr.f32.mxu0 %v430_v17  ;;  %1181 = vmatprep.mubr.f32.mxu1 %v438_v18 }
 0x160   : > { %1170 = vmatmul.mubr.f32.vlgmr.msra.gmra.mxu0 %v431_v19  ;;  %1182 = vmatmul.mubr.f32.vlgmr.msra.gmra.mxu1 %v439_v20 }
 0x161   : > { %1172 = vmatprep.mubr.f32.mxu0 %v432_v21  ;;  %1184 = vmatprep.mubr.f32.mxu1 %v440_v22 }
 0x164   : > { %1173 = vmatmul.mubr.f32.gmra.mxu0 %v433_v23  ;;  %1185 = vmatmul.mubr.f32.gmra.mxu1 %v441_v24 }
 0x165   : > { %1175 = vmatprep.mubr.f32.mxu0 %v434_v25  ;;  %1187 = vmatprep.mubr.f32.mxu1 %v442_v26 }
 0x168   : > { %1176 = vmatmul.mubr.f32.gmra.mxu0 %v435_v27  ;;  %1188 = vmatmul.mubr.f32.gmra.mxu1 %v443_v28 }
 0x169   : > { %1178 = vmatprep.mubr.f32.mxu0 %v436_v29  ;;  %1190 = vmatprep.mubr.f32.mxu1 %v444_v30 }
 0x16c   : > { %1179 = vmatmul.mubr.f32.gmra.mxu0 %v437_v31  ;;  %1191 = vmatmul.mubr.f32.gmra.mxu1 %v445_v32 }
 0x220   : > { %v1171_v33 = vpop.f32.mrf.mxu0  ;;  %v1183_v34 = vpop.f32.mrf.mxu1 }
 0x221   : > { %644 = vst [vmem:[#allocation2 + $0x8] sm:$0xff] %v1171_v33  ;;  %652 = vst [vmem:[#allocation2 + $0x48] sm:$0xff] %v1183_v34 }
 0x222   : > { %v528_v37 = vpop.f32.mrf.mxu0  ;;  %v568_v38 = vpop.f32.mrf.mxu1 }
 0x223   : > { %643 = vst [vmem:[#allocation2] sm:$0xff] %v528_v37  ;;  %651 = vst [vmem:[#allocation2 + $0x40] sm:$0xff] %v568_v38 }
 0x224   : > { %v1174_v41 = vpop.f32.mrf.mxu0  ;;  %v1186_v42 = vpop.f32.mrf.mxu1 }
 0x225   : > { %646 = vst [vmem:[#allocation2 + $0x18] sm:$0xff] %v1174_v41  ;;  %654 = vst [vmem:[#allocation2 + $0x58] sm:$0xff] %v1186_v42 }
 0x226   : > { %v538_v45 = vpop.f32.mrf.mxu0  ;;  %v578_v46 = vpop.f32.mrf.mxu1 }
 0x227   : > { %645 = vst [vmem:[#allocation2 + $0x10] sm:$0xff] %v538_v45  ;;  %653 = vst [vmem:[#allocation2 + $0x50] sm:$0xff] %v578_v46 }
 0x228   : > { %v1177_v49 = vpop.f32.mrf.mxu0  ;;  %v1189_v50 = vpop.f32.mrf.mxu1 }
 0x229   : > { %648 = vst [vmem:[#allocation2 + $0x28] sm:$0xff] %v1177_v49  ;;  %656 = vst [vmem:[#allocation2 + $0x68] sm:$0xff] %v1189_v50 }
 0x22a   : > { %v548_v53 = vpop.f32.mrf.mxu0  ;;  %v588_v54 = vpop.f32.mrf.mxu1 }
 0x22b   : > { %647 = vst [vmem:[#allocation2 + $0x20] sm:$0xff] %v548_v53  ;;  %655 = vst [vmem:[#allocation2 + $0x60] sm:$0xff] %v588_v54 }
 0x22c   : > { %v1180_v57 = vpop.f32.mrf.mxu0  ;;  %v1192_v58 = vpop.f32.mrf.mxu1 }
 0x22d   : > { %650 = vst [vmem:[#allocation2 + $0x38] sm:$0xff] %v1180_v57  ;;  %658 = vst [vmem:[#allocation2 + $0x78] sm:$0xff] %v1192_v58 }
 0x22e   : > { %v558_v61 = vpop.f32.mrf.mxu0  ;;  %v598_v62 = vpop.f32.mrf.mxu1 }
 0x22f   : > { %649 = vst [vmem:[#allocation2 + $0x30] sm:$0xff] %v558_v61  ;;  %657 = vst [vmem:[#allocation2 + $0x70] sm:$0xff] %v598_v62 }
 0x230 PF: > { %p1008_p0 = scmp.ne.s32.totalorder %s1549_s17, 1 }
 0x232   : > { %661 = sbr.rel (%p1008_p0) target bundleno = 919 (0x397), region = 56 }
 0x237   : > { %v662_v1 = vlaneseq }
 0x239   : > { %v1761_v2 = vand.u32 127, %v662_v1 }
 0x23b   : > { %vm664_vm0 = vcmp.lt.s32.totalorder %v1761_v2, 8 }
 0x23c   : > { %v665_v3 = vsel %vm664_vm0, %v1699_v39, -inf  ;;  %v667_v4 = vsel %vm664_vm0, %v1707_v47, -inf  ;;  %v666_v5 = vsel %vm664_vm0, %v1695_v35, -inf  ;;  %v668_v6 = vsel %vm664_vm0, %v1703_v43, -inf }
 0x23d   : > { %681 = vmax.xlane.f32.xlu0 %v665_v3  ;;  %685 = vmax.xlane.f32.xlu1 %v667_v4  ;;  %v669_v39 = vsel %vm664_vm0, %v1715_v55, -inf  ;;  %v670_v47 = vsel %vm664_vm0, %v1711_v51, -inf  ;;  %v671_v35 = vsel %vm664_vm0, %v1723_v63, -inf  ;;  %v672_v43 = vsel %vm664_vm0, %v1719_v59, -inf }
 0x23e   : > { %v673_v55 = vsel %vm664_vm0, %v1701_v40, -inf  ;;  %v674_v51 = vsel %vm664_vm0, %v1697_v36, -inf  ;;  %v675_v63 = vsel %vm664_vm0, %v1709_v48, -inf  ;;  %v676_v59 = vsel %vm664_vm0, %v1705_v44, -inf }
 0x23f   : > { %v1803_v40 = vsel %vm664_vm0, %v1717_v56, -inf  ;;  %v1808_v36 = vsel %vm664_vm0, %v1713_v52, -inf  ;;  %v1815_v44 = vsel %vm664_vm0, %v1725_v0, -inf  ;;  %v1820_v48 = vsel %vm664_vm0, %v1721_v60, -inf }
 0x241   : > { %683 = vmax.xlane.f32.xlu0 %v666_v5  ;;  %687 = vmax.xlane.f32.xlu1 %v668_v6 }
 0x245   : > { %689 = vmax.xlane.f32.xlu0 %v669_v39  ;;  %691 = vmax.xlane.f32.xlu1 %v670_v47 }
 0x249   : > { %693 = vmax.xlane.f32.xlu0 %v671_v35  ;;  %695 = vmax.xlane.f32.xlu1 %v672_v43 }
 0x24d   : > { %697 = vmax.xlane.f32.xlu0 %v673_v55  ;;  %699 = vmax.xlane.f32.xlu1 %v674_v51 }
 0x251   : > { %701 = vmax.xlane.f32.xlu0 %v675_v63  ;;  %703 = vmax.xlane.f32.xlu1 %v676_v59 }
 0x255   : > { %705 = vmax.xlane.f32.xlu0 %v1803_v40  ;;  %707 = vmax.xlane.f32.xlu1 %v1808_v36 }
 0x259   : > { %709 = vmax.xlane.f32.xlu0 %v1815_v44  ;;  %711 = vmax.xlane.f32.xlu1 %v1820_v48 }
 0x2c6   : > { %v682_v52 = vpop.xlane.xlu0 %681  ;;  %v686_v56 = vpop.xlane.xlu1 %685 }
 0x2c7   : > { %v1824_v7 = vsub.f32 %v665_v3, %v682_v52  ;;  %v1826_v8 = vsub.f32 %v667_v4, %v686_v56 }
 0x2c9   : > { %v729_v9 = vmul.f32 1.442695, %v1824_v7  ;;  %v733_v0 = vmul.f32 1.442695, %v1826_v8 }
 0x2ca   : > { %v684_v10 = vpop.xlane.xlu0 %683  ;;  %v688_v11 = vpop.xlane.xlu1 %687 }
 0x2cb   : > { %1334 = vpow2.f32 %v729_v9  ;;  %v1830_v12 = vsub.f32 %v666_v5, %v684_v10  ;;  %v1832_v60 = vsub.f32 %v668_v6, %v688_v11 }
 0x2cc   : > { %1336 = vpow2.f32 %v733_v0 }
 0x2cd   : > { %v731_v13 = vmul.f32 1.442695, %v1830_v12  ;;  %v735_v14 = vmul.f32 1.442695, %v1832_v60 }
 0x2ce   : > { %v690_v15 = vpop.xlane.xlu0 %689  ;;  %v692_v16 = vpop.xlane.xlu1 %691 }
 0x2cf   : > { %1338 = vpow2.f32 %v731_v13  ;;  %v1836_v17 = vsub.f32 %v669_v39, %v690_v15  ;;  %v1838_v18 = vsub.f32 %v670_v47, %v692_v16 }
 0x2d0   : > { %1340 = vpow2.f32 %v735_v14 }
 0x2d1   : > { %v737_v19 = vmul.f32 1.442695, %v1836_v17  ;;  %v739_v20 = vmul.f32 1.442695, %v1838_v18 }
 0x2d2   : > { %v694_v21 = vpop.xlane.xlu0 %693  ;;  %v696_v22 = vpop.xlane.xlu1 %695 }
 0x2d3   : > { %1342 = vpow2.f32 %v737_v19  ;;  %v1842_v23 = vsub.f32 %v671_v35, %v694_v21  ;;  %v1844_v24 = vsub.f32 %v672_v43, %v696_v22 }
 0x2d4   : > { %1344 = vpow2.f32 %v739_v20 }
 0x2d5   : > { %v741_v25 = vmul.f32 1.442695, %v1842_v23  ;;  %v743_v26 = vmul.f32 1.442695, %v1844_v24 }
 0x2d6   : > { %v698_v27 = vpop.xlane.xlu0 %697  ;;  %v700_v28 = vpop.xlane.xlu1 %699 }
 0x2d7   : > { %1346 = vpow2.f32 %v741_v25  ;;  %v1848_v29 = vsub.f32 %v673_v55, %v698_v27  ;;  %v1850_v30 = vsub.f32 %v674_v51, %v700_v28 }
 0x2d8   : > { %v1335_v31 = vpop.eup %1334  ;;  %1348 = vpow2.f32 %v743_v26 }
 0x2d9   : > { %v745_v32 = vmul.f32 1.442695, %v1848_v29  ;;  %761 = vadd.xlane.f32.xlu0 %v1335_v31  ;;  %v747_v33 = vmul.f32 1.442695, %v1850_v30  ;;  %v1337_v34 = vpop.eup %1336 }
 0x2da   : > { %v702_v37 = vpop.xlane.xlu0 %701  ;;  %v704_v38 = vpop.xlane.xlu1 %703 }
 0x2db   : > { %1350 = vpow2.f32 %v745_v32  ;;  %v1854_v41 = vsub.f32 %v675_v63, %v702_v37  ;;  %v1856_v42 = vsub.f32 %v676_v59, %v704_v38 }
 0x2dc   : > { %v1339_v45 = vpop.eup %1338  ;;  %1352 = vpow2.f32 %v747_v33 }
 0x2dd   : > { %v749_v46 = vmul.f32 1.442695, %v1854_v41  ;;  %765 = vadd.xlane.f32.xlu0 %v1337_v34  ;;  %763 = vadd.xlane.f32.xlu1 %v1339_v45  ;;  %v751_v49 = vmul.f32 1.442695, %v1856_v42  ;;  %v1341_v50 = vpop.eup %1340 }
 0x2de   : > { %v706_v53 = vpop.xlane.xlu0 %705  ;;  %v708_v54 = vpop.xlane.xlu1 %707 }
 0x2df   : > { %1354 = vpow2.f32 %v749_v46  ;;  %v1861_v57 = vsub.f32 %v1803_v40, %v706_v53  ;;  %v1864_v58 = vsub.f32 %v1808_v36, %v708_v54 }
 0x2e0   : > { %v1343_v61 = vpop.eup %1342  ;;  %1356 = vpow2.f32 %v751_v49 }
 0x2e1   : > { %v753_v62 = vmul.f32 1.442695, %v1861_v57  ;;  %767 = vadd.xlane.f32.xlu1 %v1341_v50  ;;  %769 = vadd.xlane.f32.xlu0 %v1343_v61  ;;  %v755_v1 = vmul.f32 1.442695, %v1864_v58  ;;  %v1345_v3 = vpop.eup %1344 }
 0x2e2   : > { %v710_v4 = vpop.xlane.xlu0 %709  ;;  %v712_v5 = vpop.xlane.xlu1 %711 }
 0x2e3   : > { %1358 = vpow2.f32 %v753_v62  ;;  %v1869_v6 = vsub.f32 %v1815_v44, %v710_v4  ;;  %v1872_v39 = vsub.f32 %v1820_v48, %v712_v5 }
 0x2e4   : > { %v1347_v47 = vpop.eup %1346  ;;  %1360 = vpow2.f32 %v755_v1 }
 0x2e5   : > { %v757_v35 = vmul.f32 1.442695, %v1869_v6  ;;  %771 = vadd.xlane.f32.xlu1 %v1345_v3  ;;  %773 = vadd.xlane.f32.xlu0 %v1347_v47  ;;  %v759_v43 = vmul.f32 1.442695, %v1872_v39  ;;  %v1349_v55 = vpop.eup %1348 }
 0x2e7   : > { %1362 = vpow2.f32 %v757_v35 }
 0x2e8   : > { %v1351_v51 = vpop.eup %1350  ;;  %1364 = vpow2.f32 %v759_v43 }
 0x2e9   : > { %775 = vadd.xlane.f32.xlu1 %v1349_v55  ;;  %777 = vadd.xlane.f32.xlu0 %v1351_v51  ;;  %v1353_v63 = vpop.eup %1352 }
 0x2ec   : > { %v1355_v59 = vpop.eup %1354 }
 0x2ed   : > { %779 = vadd.xlane.f32.xlu1 %v1353_v63  ;;  %781 = vadd.xlane.f32.xlu0 %v1355_v59  ;;  %v1357_v40 = vpop.eup %1356 }
 0x2f0   : > { %v1359_v36 = vpop.eup %1358 }
 0x2f1   : > { %783 = vadd.xlane.f32.xlu1 %v1357_v40  ;;  %785 = vadd.xlane.f32.xlu0 %v1359_v36  ;;  %v1361_v44 = vpop.eup %1360 }
 0x2f4   : > { %v1363_v48 = vpop.eup %1362 }
 0x2f5   : > { %787 = vadd.xlane.f32.xlu1 %v1361_v44  ;;  %789 = vadd.xlane.f32.xlu0 %v1363_v48  ;;  %v1365_v52 = vpop.eup %1364 }
 0x2f9   : > { %791 = vadd.xlane.f32.xlu1 %v1365_v52 }
 0x362   : > { %v762_v56 = vpop.xlane.xlu0 %761 }
 0x363   : > { %1366 = vlog2.f32 %v762_v56 }
 0x366   : > { %v764_v9 = vpop.xlane.xlu1 %763  ;;  %v766_v0 = vpop.xlane.xlu0 %765 }
 0x367   : > { %1368 = vlog2.f32 %v764_v9 }
 0x368   : > { %1370 = vlog2.f32 %v766_v0 }
 0x36a   : > { %v768_v10 = vpop.xlane.xlu1 %767  ;;  %v770_v11 = vpop.xlane.xlu0 %769 }
 0x36b   : > { %1372 = vlog2.f32 %v768_v10 }
 0x36c   : > { %1374 = vlog2.f32 %v770_v11 }
 0x36e   : > { %v772_v13 = vpop.xlane.xlu1 %771  ;;  %v774_v14 = vpop.xlane.xlu0 %773 }
 0x36f   : > { %1376 = vlog2.f32 %v772_v13 }
 0x370   : > { %v1367_v15 = vpop.eup %1366  ;;  %1378 = vlog2.f32 %v774_v14 }
 0x371   : > { %v794_v16 = vmul.f32 0.6931472, %v1367_v15 }
 0x372   : > { %v776_v19 = vpop.xlane.xlu1 %775  ;;  %v778_v20 = vpop.xlane.xlu0 %777 }
 0x373   : > { %v825_v21 = vsub.f32 %v1824_v7, %v794_v16  ;;  %1380 = vlog2.f32 %v776_v19 }
 0x374   : > { %v1369_v22 = vpop.eup %1368  ;;  %1382 = vlog2.f32 %v778_v20 }
 0x375   : > { %v1371_v25 = vpop.eup %1370  ;;  %v841_v26 = vsel %vm664_vm0, %v825_v21, 0.0  ;;  %v796_v27 = vmul.f32 0.6931472, %v1369_v22 }
 0x376   : > { %857 = vst [vmem:[#allocation9] sm:$0xff] %v841_v26  ;;  %v798_v28 = vmul.f32 0.6931472, %v1371_v25  ;;  %v780_v31 = vpop.xlane.xlu1 %779  ;;  %v782_v32 = vpop.xlane.xlu0 %781 }
 0x377   : > { %v826_v33 = vsub.f32 %v1830_v12, %v796_v27  ;;  %1384 = vlog2.f32 %v780_v31 }
 0x378   : > { %v1373_v34 = vpop.eup %1372  ;;  %v827_v37 = vsub.f32 %v1826_v8, %v798_v28  ;;  %1386 = vlog2.f32 %v782_v32 }
 0x379   : > { %v1375_v7 = vpop.eup %1374  ;;  %v842_v38 = vsel %vm664_vm0, %v826_v33, 0.0  ;;  %v800_v45 = vmul.f32 0.6931472, %v1373_v34 }
 0x37a   : > { %858 = vst [vmem:[#allocation9 + $0x8] sm:$0xff] %v842_v38  ;;  %v843_v46 = vsel %vm664_vm0, %v827_v37, 0.0  ;;  %v802_v49 = vmul.f32 0.6931472, %v1375_v7  ;;  %v784_v50 = vpop.xlane.xlu1 %783  ;;  %v786_v53 = vpop.xlane.xlu0 %785 }
 0x37b   : > { %859 = vst [vmem:[#allocation9 + $0x10] sm:$0xff] %v843_v46  ;;  %v828_v12 = vsub.f32 %v1832_v60, %v800_v45  ;;  %1388 = vlog2.f32 %v784_v50 }
 0x37c   : > { %v1377_v54 = vpop.eup %1376  ;;  %v829_v8 = vsub.f32 %v1836_v17, %v802_v49  ;;  %1390 = vlog2.f32 %v786_v53 }
 0x37d   : > { %v1379_v61 = vpop.eup %1378  ;;  %v844_v62 = vsel %vm664_vm0, %v828_v12, 0.0  ;;  %v804_v1 = vmul.f32 0.6931472, %v1377_v54 }
 0x37e   : > { %860 = vst [vmem:[#allocation9 + $0x18] sm:$0xff] %v844_v62  ;;  %v845_v3 = vsel %vm664_vm0, %v829_v8, 0.0  ;;  %v806_v4 = vmul.f32 0.6931472, %v1379_v61  ;;  %v788_v5 = vpop.xlane.xlu1 %787  ;;  %v790_v47 = vpop.xlane.xlu0 %789 }
 0x37f   : > { %861 = vst [vmem:[#allocation9 + $0x20] sm:$0xff] %v845_v3  ;;  %v830_v60 = vsub.f32 %v1838_v18, %v804_v1  ;;  %1392 = vlog2.f32 %v788_v5 }
 0x380   : > { %v1381_v35 = vpop.eup %1380  ;;  %v831_v17 = vsub.f32 %v1842_v23, %v806_v4  ;;  %1394 = vlog2.f32 %v790_v47 }
 0x381   : > { %v1383_v43 = vpop.eup %1382  ;;  %v846_v55 = vsel %vm664_vm0, %v830_v60, 0.0  ;;  %v808_v51 = vmul.f32 0.6931472, %v1381_v35 }
 0x382   : > { %862 = vst [vmem:[#allocation9 + $0x28] sm:$0xff] %v846_v55  ;;  %v847_v63 = vsel %vm664_vm0, %v831_v17, 0.0  ;;  %v810_v59 = vmul.f32 0.6931472, %v1383_v43  ;;  %v792_v40 = vpop.xlane.xlu1 %791 }
 0x383   : > { %863 = vst [vmem:[#allocation9 + $0x30] sm:$0xff] %v847_v63  ;;  %v832_v36 = vsub.f32 %v1844_v24, %v808_v51  ;;  %1396 = vlog2.f32 %v792_v40 }
 0x384   : > { %v1385_v18 = vpop.eup %1384  ;;  %v833_v44 = vsub.f32 %v1848_v29, %v810_v59 }
 0x385   : > { %v1387_v23 = vpop.eup %1386  ;;  %v848_v48 = vsel %vm664_vm0, %v832_v36, 0.0  ;;  %v812_v52 = vmul.f32 0.6931472, %v1385_v18 }
 0x386   : > { %864 = vst [vmem:[#allocation9 + $0x38] sm:$0xff] %v848_v48  ;;  %v849_v56 = vsel %vm664_vm0, %v833_v44, 0.0  ;;  %v814_v9 = vmul.f32 0.6931472, %v1387_v23 }
 0x387   : > { %865 = vst [vmem:[#allocation9 + $0x40] sm:$0xff] %v849_v56  ;;  %v834_v0 = vsub.f32 %v1850_v30, %v812_v52 }
 0x388   : > { %v1389_v10 = vpop.eup %1388  ;;  %v835_v24 = vsub.f32 %v1854_v41, %v814_v9 }
 0x389   : > { %v1391_v11 = vpop.eup %1390  ;;  %v850_v29 = vsel %vm664_vm0, %v834_v0, 0.0  ;;  %v816_v13 = vmul.f32 0.6931472, %v1389_v10 }
 0x38a   : > { %866 = vst [vmem:[#allocation9 + $0x48] sm:$0xff] %v850_v29  ;;  %v851_v14 = vsel %vm664_vm0, %v835_v24, 0.0  ;;  %v818_v15 = vmul.f32 0.6931472, %v1391_v11 }
 0x38b   : > { %867 = vst [vmem:[#allocation9 + $0x50] sm:$0xff] %v851_v14  ;;  %v836_v16 = vsub.f32 %v1856_v42, %v816_v13 }
 0x38c   : > { %v1393_v19 = vpop.eup %1392  ;;  %v837_v20 = vsub.f32 %v1861_v57, %v818_v15 }
 0x38d   : > { %v1395_v30 = vpop.eup %1394  ;;  %v852_v41 = vsel %vm664_vm0, %v836_v16, 0.0  ;;  %v820_v21 = vmul.f32 0.6931472, %v1393_v19 }
 0x38e   : > { %868 = vst [vmem:[#allocation9 + $0x58] sm:$0xff] %v852_v41  ;;  %v853_v22 = vsel %vm664_vm0, %v837_v20, 0.0  ;;  %v822_v25 = vmul.f32 0.6931472, %v1395_v30 }
 0x38f   : > { %869 = vst [vmem:[#allocation9 + $0x60] sm:$0xff] %v853_v22  ;;  %v838_v26 = vsub.f32 %v1864_v58, %v820_v21 }
 0x390   : > { %v1397_v27 = vpop.eup %1396  ;;  %v839_v28 = vsub.f32 %v1869_v6, %v822_v25 }
 0x391   : > { %v854_v42 = vsel %vm664_vm0, %v838_v26, 0.0  ;;  %v824_v57 = vmul.f32 0.6931472, %v1397_v27 }
 0x392   : > { %870 = vst [vmem:[#allocation9 + $0x68] sm:$0xff] %v854_v42  ;;  %v855_v31 = vsel %vm664_vm0, %v839_v28, 0.0 }
 0x393   : > { %871 = vst [vmem:[#allocation9 + $0x70] sm:$0xff] %v855_v31  ;;  %v840_v32 = vsub.f32 %v1872_v39, %v824_v57 }
 0x395   : > { %v856_v33 = vsel %vm664_vm0, %v840_v32, 0.0 }
 0x396   : > { %872 = vst [vmem:[#allocation9 + $0x78] sm:$0xff] %v856_v33 }
 0x397 PF: > { %p1926_p1 = scmp.eq.s32.totalorder %s996_s20, 1  ;;  %s1564_s13 = smov [#allocation9]  }
 0x398   : > { %s889_s14 = sshll.u32 %s1564_s13, 4  ;;  %s890_s14 = int_to_ptr.vmem [resolvable:$true] %s889_s14 }
 0x399   : > { %s1474_s15 = scalar_lea.vmem %s890_s14, 2048  ;;  %s1480_s24 = scalar_lea.vmem %s890_s14, 4096 }
 0x39a   : > { %p1475_p2 = scmp.ne.s32.totalorder %s890_s14, %s1474_s15  ;;  %p1481_p5 = scmp.lt.s32.totalorder %s890_s14, %s890_s14 }
 0x39b   : > { %p1482_p8 = scmp.lt.s32.totalorder %s1480_s24, %s1474_s15 }
 0x39c   : > { %p1476_p3 = pnand %p1475_p2, %p1926_p1 }
 0x39d   : > { %p1483_p11 = por %p1482_p8, %p1481_p5 }
 0x39e   : > { %p1477_p4 = pneg %p1476_p3 }
 0x3a0   : > { %p1484_p13 = pnand %p1483_p11, %p1477_p4 }
 0x3a2   : > { %1487 = shalt.err (!%p1484_p13)
}
 0x3a3   : > { %s1565_s25 = smov 128   ;;  %s1566_s20 = smov 8  }
 0x3a4   : > { %1264 = dma.vmem_to_hbm [thread:$0]  (%p1926_p1), %s890_s14, 2048, %s1959_s4, [#allocation8], %s1565_s25, %s1565_s25, %s1566_s20  }
 0x3a5 PF: > { %p1278_p12 = scmp.eq.s32.totalorder %s997_s21, 1  ;;  %p1966_p6 = scmp.ge.s32.totalorder %s1557_s19, 2 }
 0x3a7   : > { %p1272_p7 = pnand %p1278_p12, %p1966_p6 }
 0x3a9   : > { %p1273_p10 = pneg %p1272_p7 }
 0x3ab   : > { %1535 = dma.done.wait (%p1273_p10), [#allocation8], 2048  }
 0x3ac   : > { %1537 = vsyncadd (%p1273_p10), [#allocation8], 4294965248  ;;  %s20_s19 = sadd.s32 1, %s1557_s19   ;;  %s1967_s15 = smov %s1545_s16 }
 0x3ad   : > { %p17_p9 = scmp.ge.s32.totalorder %s20_s19, 4   ;;  %s1945_s16 = smov 0  }
 0x3ae   : > { %s1968_s17 = smov %s1553_s18  ;;  %s1969_s18 = smov %s1971_s22 }
 0x3af   :  { %19 = sbr.rel (!%p17_p9) target bundleno = 6 (0x6), region = 104 }
 0x3b4   :  { %910 = vsyncpa [#allocation7], 1 }
 0x3b5   :  { %912 = vsyncpa [#allocation7 + $0x1], 1 }
 0x3b6   :  { %913 = vsyncpa [#allocation8], 1 }
 0x3b7   :  { %915 = vsyncpa [#allocation8 + $0x1], 1 }
 0x3b8   :  { %916 = vsyncmov [#allocation4] }
 0x3bb   :  { %s917_s21 = vpop.sfrf %916 }
 0x3bc   :  { %p1013_p0 = scmp.ne.s32.totalorder %s917_s21, 0 }
 0x3be   :  { %921 = shalt.err (%p1013_p0)  }
 0x3bf   :  { %923 = vsyncmov [#allocation4 + $0x1] }
 0x3c2   :  { %s924_s28 = vpop.sfrf %923 }
 0x3c3   :  { %p1014_p1 = scmp.ne.s32.totalorder %s924_s28, 0 }
 0x3c5   :  { %928 = shalt.err (%p1014_p1)  }

</bundles_post_ra>
